<compile_context>
chip_gen: v6e
topology: v6e:2x2x1
jax: 0.10.0
libtpu: 0.0.40
codegen_flags: <defaults>
</compile_context>

<pallas_src>
import math
import functools

import jax
import jax.numpy as jnp
from jax.experimental import pallas as pl
from jax.experimental.pallas import tpu as pltpu


# ----------------------------------------------------------------------------
# Sinusoidal table, identical to the PyTorch __init__.
# ----------------------------------------------------------------------------
def build_pos_embedding(emb_size: int, maxlen: int) -> jnp.ndarray:
    den = jnp.exp(-jnp.arange(0, emb_size, 2, dtype=jnp.float32)
                  * (math.log(10000.0) / emb_size))
    pos = jnp.arange(0, maxlen, dtype=jnp.float32).reshape(maxlen, 1)
    pe = jnp.zeros((maxlen, emb_size), dtype=jnp.float32)
    pe = pe.at[:, 0::2].set(jnp.sin(pos * den))
    pe = pe.at[:, 1::2].set(jnp.cos(pos * den))
    return pe[:, None, :]  # (maxlen, 1, emb_size)


# ----------------------------------------------------------------------------
# Kernels
# ----------------------------------------------------------------------------
def _pe_eval_kernel(x_ref, pos_ref, o_ref):
    # x_ref: (tS, B, E), pos_ref: (tS, 1, E) — broadcast over batch.
    y = x_ref[...].astype(jnp.float32) + pos_ref[...]
    o_ref[...] = y.astype(o_ref.dtype)


def _make_pe_train_kernel(dropout_p: float):
    # Inverted dropout: keep with prob (1-p), scale kept values by 1/(1-p).
    # Integer threshold compare: keep iff bits >= round(p * 2^32).
    threshold = min(int(round(dropout_p * 4294967296.0)), 4294967295)
    scale = 1.0 / (1.0 - dropout_p)

    def kernel(x_ref, pos_ref, bits_ref, o_ref):
        y = x_ref[...].astype(jnp.float32) + pos_ref[...]
        keep = bits_ref[...] >= jnp.uint32(threshold)
        y = jnp.where(keep, y * jnp.float32(scale), jnp.float32(0.0))
        o_ref[...] = y.astype(o_ref.dtype)

    return kernel


# ----------------------------------------------------------------------------
# Tile sizing: keep total pipelined buffering well under the smallest scoped
# VMEM (v5e default 16 MiB, v7x physical 64 MiB) while amortizing per-step cost.
# ----------------------------------------------------------------------------
def _choose_seq_tile(S: int, B: int, E: int, itemsize: int, with_bits: bool,
                     budget_bytes: int = 20 * 1024 * 1024) -> int:
    n_streams = 2 + (1 if with_bits else 0)          # x, out (+ bits)
    per_row = n_streams * B * E * max(itemsize, 4) + E * 4   # + pos row (f32)
    per_row *= 2                                      # double-buffered
    tS = max(1, budget_bytes // max(per_row, 1))
    if tS >= 8:
        tS = (tS // 8) * 8
    return int(min(S, tS))


# ----------------------------------------------------------------------------
# Forward wrapper
# ----------------------------------------------------------------------------
@functools.partial(jax.jit, static_argnames=("dropout_p", "training"))
def positional_encoding_forward(token_embedding: jnp.ndarray,
                                pos_embedding: jnp.ndarray,
                                rng_key: jax.Array,
                                *,
                                dropout_p: float,
                                training: bool) -> jnp.ndarray:
    """token_embedding: (S, B, E); pos_embedding: (maxlen, 1, E), maxlen >= S."""
    S, B, E = token_embedding.shape
    use_dropout = bool(training) and dropout_p > 0.0

    tS = _choose_seq_tile(S, B, E, token_embedding.dtype.itemsize, use_dropout)
    grid = (pl.cdiv(S, tS),)

    x_spec = pl.BlockSpec((tS, B, E), lambda i: (i, 0, 0))
    # Full (maxlen, 1, E) table: block index i picks rows [i*tS, (i+1)*tS) directly,
    # which is exactly pos_embedding[:S] tiled the same way as token_embedding.
    pos_spec = pl.BlockSpec((tS, 1, E), lambda i: (i, 0, 0))
    out_spec = pl.BlockSpec((tS, B, E), lambda i: (i, 0, 0))

    compiler_params = pltpu.CompilerParams(
        dimension_semantics=("parallel",),          # megacore sharding on v7x; no-op v5e/v6e
        vmem_limit_bytes=48 * 1024 * 1024,
    )

    if use_dropout:
        # Independent uint32 bits per element; tiled like x -> per-tile decorrelated masks.
        bits = jax.random.bits(rng_key, (S, B, E), dtype=jnp.uint32)
        kernel = _make_pe_train_kernel(float(dropout_p))
        return pl.pallas_call(
            kernel,
            out_shape=jax.ShapeDtypeStruct(token_embedding.shape, token_embedding.dtype),
            grid=grid,
            in_specs=[x_spec, pos_spec, pl.BlockSpec((tS, B, E), lambda i: (i, 0, 0))],
            out_specs=out_spec,
            compiler_params=compiler_params,
        )(token_embedding, pos_embedding, bits)

    return pl.pallas_call(
        _pe_eval_kernel,
        out_shape=jax.ShapeDtypeStruct(token_embedding.shape, token_embedding.dtype),
        grid=grid,
        in_specs=[x_spec, pos_spec],
        out_specs=out_spec,
        compiler_params=compiler_params,
    )(token_embedding, pos_embedding)


# ----------------------------------------------------------------------------
# Test
# ----------------------------------------------------------------------------
if __name__ == "__main__":
    # Small shapes consistent with (seq, batch, emb). E=128 keeps the output lane-dense.
    SEQ, BATCH, EMB = 8, 2, 128
    MAXLEN = 64
    DROPOUT_P = 0.1

    root = jax.random.PRNGKey(0)
    k_x, k_drop = jax.random.split(root)
    x = jax.random.normal(k_x, (SEQ, BATCH, EMB), dtype=jnp.float32)
    pos_embedding = build_pos_embedding(EMB, MAXLEN)

    ref = x + pos_embedding[:SEQ]

    # Eval mode (dropout is identity) — exact reference check.
    out_eval = positional_encoding_forward(
        x, pos_embedding, k_drop, dropout_p=DROPOUT_P, training=False)
    out_eval = jax.block_until_ready(out_eval)
    assert out_eval.shape == x.shape and out_eval.dtype == x.dtype
    assert jnp.allclose(out_eval, ref, atol=1e-6, rtol=1e-6)

    # Training mode — every output element is either 0 (dropped) or ref/(1-p) (kept).
    out_train = positional_encoding_forward(
        x, pos_embedding, k_drop, dropout_p=DROPOUT_P, training=True)
    out_train = jax.block_until_ready(out_train)
    assert out_train.shape == x.shape and out_train.dtype == x.dtype

    scale = 1.0 / (1.0 - DROPOUT_P)
    kept = out_train != 0.0
    assert jnp.allclose(out_train[kept], (ref * scale)[kept], atol=1e-5, rtol=1e-5)
    keep_frac = float(jnp.mean(kept.astype(jnp.float32)))
    assert 0.75 <= keep_frac <= 1.0  # statistical sanity (expected ~0.9)

    print("KERNEL_OK")
</pallas_src>

<mosaic_0001>
module attributes {stable_mosaic.version = 11 : i64} {
  func.func @_pe_eval_kernel(%arg0: i32, %arg1: memref<8x2x128xf32, #tpu.memory_space<vmem>>, %arg2: memref<8x1x128xf32, #tpu.memory_space<vmem>>, %arg3: memref<8x2x128xf32, #tpu.memory_space<vmem>>) attributes {dimension_semantics = [#tpu.dimension_semantics<parallel>], iteration_bounds = array<i64: 1>, scalar_prefetch = 0 : i64, scratch_operands = 0 : i64, tpu.core_type = #tpu.core_type<tc>, window_params = [{transform_indices = @transform_0, window_bounds = array<i64: 8, 2, 128>}, {transform_indices = @transform_1, window_bounds = array<i64: 8, 1, 128>}, {transform_indices = @transform_2, window_bounds = array<i64: 8, 2, 128>}]} {
    %c0 = arith.constant 0 : index
    %c0_0 = arith.constant 0 : index
    %c0_1 = arith.constant 0 : index
    %0 = vector.load %arg1[%c0, %c0_0, %c0_1] : memref<8x2x128xf32, #tpu.memory_space<vmem>>, vector<8x2x128xf32>
    %c0_2 = arith.constant 0 : index
    %c0_3 = arith.constant 0 : index
    %c0_4 = arith.constant 0 : index
    %1 = vector.load %arg2[%c0_2, %c0_3, %c0_4] : memref<8x1x128xf32, #tpu.memory_space<vmem>>, vector<8x1x128xf32>
    %2 = vector.broadcast %1 : vector<8x1x128xf32> to vector<8x2x128xf32>
    %3 = arith.addf %0, %2 : vector<8x2x128xf32>
    %c0_5 = arith.constant 0 : index
    %c0_6 = arith.constant 0 : index
    %c0_7 = arith.constant 0 : index
    %4 = vector.load %arg3[%c0_5, %c0_6, %c0_7] : memref<8x2x128xf32, #tpu.memory_space<vmem>>, vector<8x2x128xf32>
    tpu.vector_store %arg3[%c0_5, %c0_6, %c0_7], %3 {strides = array<i32>} : memref<8x2x128xf32, #tpu.memory_space<vmem>>, vector<8x2x128xf32>,
    return
  }
  func.func @transform_0(%arg0: i32) -> (i32, i32, i32) {
    %c0_i32 = arith.constant 0 : i32
    %c0_i32_0 = arith.constant 0 : i32
    %c0_i32_1 = arith.constant 0 : i32
    return %arg0, %c0_i32, %c0_i32_0 : i32, i32, i32
  }
  func.func @transform_1(%arg0: i32) -> (i32, i32, i32) {
    %c0_i32 = arith.constant 0 : i32
    %c0_i32_0 = arith.constant 0 : i32
    %c0_i32_1 = arith.constant 0 : i32
    return %arg0, %c0_i32, %c0_i32_0 : i32, i32, i32
  }
  func.func @transform_2(%arg0: i32) -> (i32, i32, i32) {
    %c0_i32 = arith.constant 0 : i32
    %c0_i32_0 = arith.constant 0 : i32
    %c0_i32_1 = arith.constant 0 : i32
    return %arg0, %c0_i32, %c0_i32_0 : i32, i32, i32
  }
}

</mosaic_0001>

<bundles_post_ra>
// kernel: positional_encoding_forward.1
= control target key start
LH: loop header
LB: loop body
LE: loop exit
PB: predicated region body
PF: predicated region fallthrough
CT: control target
= control target key end

     0   :  { %7 = vsyncpa [#allocation3], 0  ;;  %s259_s0 = inlined_call_operand.hbm [shape: f32[8,2,128], index: 0, kind: input, shape index: {}]   ;;  %s260_s1 = inlined_call_operand.hbm [shape: f32[64,1,128], index: 1, kind: input, shape index: {}]   ;;  %s261_s2 = inlined_call_operand.hbm [shape: f32[8,2,128], index: 2, kind: output, shape index: {}]  }
   0x1   :  { %8 = vsyncpa [#allocation6], 0 }
   0x2   :  { %9 = vsyncpa [#allocation4], 0  ;;  %s219_s9 = smov [#allocation2]  }
   0x3   :  { %s15_s10 = sshll.u32 %s219_s9, 4  ;;  %s16_s10 = int_to_ptr.vmem [resolvable:$true] %s15_s10 }
   0x4   :  { %s161_s11 = scalar_lea.vmem %s16_s10, 256  ;;  %p166_p1 = scmp.lt.s32.totalorder %s16_s10, %s16_s10 }
   0x5   :  { %p162_p0 = scmp.ne.s32.totalorder %s16_s10, %s161_s11  ;;  %p167_p2 = scmp.lt.s32.totalorder %s161_s11, %s161_s11 }
   0x7   :  { %p168_p3 = por %p167_p2, %p166_p1 }
   0x9   :  { %p169_p4 = pnand %p168_p3, %p162_p0 }
   0xb   :  { %172 = shalt.err (!%p169_p4)
}
   0xc   :  { %s220_s12 = smov 32   ;;  %s221_s13 = smov 2  }
   0xd   :  { %21 = dma.hbm_to_vmem [thread:$0]  %s259_s0, 256, %s16_s10, [#allocation3], %s220_s12, %s220_s12, %s221_s13  }
   0xe   :  { %s222_s16 = smov [#allocation5]  }
   0xf   :  { %s27_s17 = sshll.u32 %s222_s16, 4  ;;  %s28_s17 = int_to_ptr.vmem [resolvable:$true] %s27_s17 }
  0x10   :  { %s181_s18 = scalar_lea.vmem %s28_s17, 128  ;;  %p186_p6 = scmp.lt.s32.totalorder %s28_s17, %s28_s17 }
  0x11   :  { %p182_p5 = scmp.ne.s32.totalorder %s28_s17, %s181_s18  ;;  %p187_p7 = scmp.lt.s32.totalorder %s181_s18, %s181_s18 }
  0x13   :  { %p188_p8 = por %p187_p7, %p186_p6 }
  0x15   :  { %p189_p9 = pnand %p188_p8, %p182_p5 }
  0x17   :  { %192 = shalt.err (!%p189_p9)
}
  0x18   :  { %s223_s19 = smov 16   ;;  %s224_s20 = smov 1  }
  0x19   :  { %33 = dma.hbm_to_vmem [thread:$0]  %s260_s1, 128, %s28_s17, [#allocation6], %s223_s19, %s223_s19, %s224_s20  }
  0x1a   :  { %213 = dma.done.wait [#allocation3], 256  }
  0x1b   :  { %214 = vsyncadd [#allocation3], 4294967040 }
  0x1c   :  { %215 = dma.done.wait [#allocation6], 128  }
  0x1d   :  { %216 = vsyncadd [#allocation6], 4294967168  ;;  %s225_s0 = smov [#allocation7]   ;;  %v40_v0 = vld [vmem:[#allocation2] sm:$0x3] }
  0x1e   :  { %s250_s23 = sshll.u32 %s225_s0, 4  ;;  %v138_v1 = vld [vmem:[#allocation5] ss:$0 sm:$0xff]  ;;  %v41_v2 = vld [vmem:[#allocation2 + $0x2] sm:$0x3]  ;;  %s126_s23 = int_to_ptr.vmem [resolvable:$true] %s250_s23 }
  0x1f   :  { %v104_v3 = vadd.f32 %v138_v1, %v40_v0  ;;  %v139_v4 = vld [vmem:[#allocation5 + $0x1] ss:$0 sm:$0xff]  ;;  %v42_v5 = vld [vmem:[#allocation2 + $0x4] sm:$0x3]  ;;  %v140_v6 = vld [vmem:[#allocation5 + $0x2] ss:$0 sm:$0xff]  ;;  %p198_p11 = scmp.lt.s32.totalorder %s126_s23, %s126_s23 }
  0x20   :  { %v105_v7 = vadd.f32 %v139_v4, %v41_v2  ;;  %v106_v8 = vadd.f32 %v140_v6, %v42_v5  ;;  %v43_v9 = vld [vmem:[#allocation2 + $0x6] sm:$0x3]  ;;  %v141_v10 = vld [vmem:[#allocation5 + $0x3] ss:$0 sm:$0xff]  ;;  %v44_v11 = vld [vmem:[#allocation2 + $0x8] sm:$0x3] }
  0x21   :  { %112 = vst [vmem:[#allocation7] sm:$0x3] %v104_v3  ;;  %v107_v12 = vadd.f32 %v141_v10, %v43_v9  ;;  %v142_v13 = vld [vmem:[#allocation5 + $0x4] ss:$0 sm:$0xff]  ;;  %v45_v14 = vld [vmem:[#allocation2 + $0xa] sm:$0x3] }
  0x22   :  { %v143_v15 = vld [vmem:[#allocation5 + $0x5] ss:$0 sm:$0xff]  ;;  %113 = vst [vmem:[#allocation7 + $0x2] sm:$0x3] %v105_v7  ;;  %114 = vst [vmem:[#allocation7 + $0x4] sm:$0x3] %v106_v8  ;;  %v108_v16 = vadd.f32 %v142_v13, %v44_v11 }
  0x23   :  { %v109_v17 = vadd.f32 %v143_v15, %v45_v14  ;;  %v46_v18 = vld [vmem:[#allocation2 + $0xc] sm:$0x3]  ;;  %v144_v19 = vld [vmem:[#allocation5 + $0x6] ss:$0 sm:$0xff]  ;;  %v47_v20 = vld [vmem:[#allocation2 + $0xe] sm:$0x3] }
  0x24   :  { %115 = vst [vmem:[#allocation7 + $0x6] sm:$0x3] %v107_v12  ;;  %v110_v21 = vadd.f32 %v144_v19, %v46_v18  ;;  %v145_v22 = vld [vmem:[#allocation5 + $0x7] ss:$0 sm:$0xff]  ;;  %116 = vst [vmem:[#allocation7 + $0x8] sm:$0x3] %v108_v16 }
  0x25   :  { %117 = vst [vmem:[#allocation7 + $0xa] sm:$0x3] %v109_v17  ;;  %v111_v23 = vadd.f32 %v145_v22, %v47_v20  ;;  %s193_s1 = scalar_lea.vmem %s126_s23, 256 }
  0x26   :  { %118 = vst [vmem:[#allocation7 + $0xc] sm:$0x3] %v110_v21  ;;  %p194_p10 = scmp.ne.s32.totalorder %s126_s23, %s193_s1  ;;  %p199_p12 = scmp.lt.s32.totalorder %s193_s1, %s193_s1 }
  0x27   :  { %119 = vst [vmem:[#allocation7 + $0xe] sm:$0x3] %v111_v23 }
  0x28   :  { %p200_p13 = por %p199_p12, %p198_p11 }
  0x2a   :  { %p201_p0 = pnand %p200_p13, %p194_p10 }
  0x2c   :  { %204 = shalt.err (!%p201_p0)
}
  0x2d   :  { %131 = dma.vmem_to_hbm [thread:$0]  %s126_s23, 256, %s261_s2, [#allocation4], %s220_s12, %s220_s12, %s221_s13  }
  0x2e   :  { %217 = dma.done.wait [#allocation4], 256  }
  0x2f   :  { %218 = vsyncadd [#allocation4], 4294967040 }
  0x30   :  { %135 = vsyncpa [#allocation3], 1 }
  0x31   :  { %136 = vsyncpa [#allocation6], 1 }
  0x32   :  { %137 = vsyncpa [#allocation4], 1 }

</bundles_post_ra>
